<compile_context>
chip_gen: v5e
topology: v5e:2x2
jax: 0.10.0
libtpu: 0.0.40
codegen_flags: <defaults>
</compile_context>

<pallas_src>
import jax
import jax.numpy as jnp
from jax.experimental import pallas as pl
from jax.experimental.pallas import tpu as pltpu


def _identity_kernel(x_ref, o_ref):
    # Pure pass-through on the current VMEM tile.
    o_ref[...] = x_ref[...]


def _choose_lane_width(total: int):
    """Largest lane-dense width (multiple of 128, up to 1024) dividing total."""
    for w in (1024, 512, 256, 128):
        if total % w == 0:
            return w
    return None


def _choose_tile_rows(rows: int, cols: int, itemsize: int) -> int:
    """Pick a row-tile that divides `rows`, is a multiple of 8, and keeps a
    single tile at or under ~2 MiB (so double-buffered in+out copies fit the
    16 MiB default scoped-VMEM limit on v5e, with lots of headroom on
    v6e/v7x)."""
    budget_rows = max(8, (2 * 1024 * 1024) // max(1, cols * itemsize))
    if rows <= budget_rows:
        return rows  # full extent along rows — always a legal block shape
    upper = min(rows, (budget_rows // 8) * 8)
    for t in range(upper, 7, -8):  # multiples of 8 only
        if rows % t == 0:
            return t
    return rows  # no aligned divisor: fall back to one full-array block


def _identity_copy_2d(flat: jax.Array) -> jax.Array:
    rows, cols = flat.shape
    tile_r = _choose_tile_rows(rows, cols, flat.dtype.itemsize)
    grid_r = rows // tile_r

    return pl.pallas_call(
        _identity_kernel,
        out_shape=jax.ShapeDtypeStruct((rows, cols), flat.dtype),
        grid=(grid_r,),
        in_specs=[pl.BlockSpec((tile_r, cols), lambda i: (i, 0))],
        out_specs=pl.BlockSpec((tile_r, cols), lambda i: (i, 0)),
        # Output aliases the (jit-internal) flattened input buffer: no new
        # HBM allocation for the result.
        input_output_aliases={0: 0},
        compiler_params=pltpu.CompilerParams(
            dimension_semantics=("parallel",),
        ),
    )(flat)


@jax.jit
def identity(x: jax.Array) -> jax.Array:
    """Identity.forward(x) == x, routed through a tiled Pallas copy kernel."""
    orig_shape = x.shape
    total = 1
    for d in orig_shape:
        total *= d

    if total == 0:
        return x  # nothing to copy

    lane_w = _choose_lane_width(total)
    if lane_w is not None:
        # Lane-dense slab: last dim is a large multiple of 128.
        flat = x.reshape(total // lane_w, lane_w)
    elif x.ndim >= 2:
        # Fallback: keep the original trailing dim on lanes.
        flat = x.reshape(-1, orig_shape[-1])
    else:
        flat = x.reshape(1, total)

    out = _identity_copy_2d(flat)
    return out.reshape(orig_shape)


if __name__ == "__main__":
    key = jax.random.PRNGKey(0)
    x = jax.random.normal(key, (2, 4, 16, 16), dtype=jnp.float32)  # NCHW

    y = identity(x)
    jax.block_until_ready(y)

    assert y.shape == x.shape
    assert y.dtype == x.dtype
    assert bool(jnp.all(y == x))

    print("KERNEL_OK")
</pallas_src>

<mosaic_0001>
module attributes {stable_mosaic.version = 11 : i64} {
  func.func @_identity_kernel(%arg0: i32, %arg1: memref<2x1024xf32, #tpu.memory_space<vmem>>, %arg2: memref<2x1024xf32, #tpu.memory_space<vmem>>) attributes {dimension_semantics = [#tpu.dimension_semantics<parallel>], iteration_bounds = array<i64: 1>, scalar_prefetch = 0 : i64, scratch_operands = 0 : i64, tpu.core_type = #tpu.core_type<tc>, window_params = [{transform_indices = @transform_0, window_bounds = array<i64: 2, 1024>}, {transform_indices = @transform_1, window_bounds = array<i64: 2, 1024>}]} {
    %c0 = arith.constant 0 : index
    %c0_0 = arith.constant 0 : index
    %0 = vector.load %arg1[%c0, %c0_0] : memref<2x1024xf32, #tpu.memory_space<vmem>>, vector<2x1024xf32>
    %c0_1 = arith.constant 0 : index
    %c0_2 = arith.constant 0 : index
    %1 = vector.load %arg2[%c0_1, %c0_2] : memref<2x1024xf32, #tpu.memory_space<vmem>>, vector<2x1024xf32>
    tpu.vector_store %arg2[%c0_1, %c0_2], %0 {strides = array<i32>} : memref<2x1024xf32, #tpu.memory_space<vmem>>, vector<2x1024xf32>,
    return
  }
  func.func @transform_0(%arg0: i32) -> (i32, i32) {
    %c0_i32 = arith.constant 0 : i32
    %c0_i32_0 = arith.constant 0 : i32
    return %arg0, %c0_i32 : i32, i32
  }
  func.func @transform_1(%arg0: i32) -> (i32, i32) {
    %c0_i32 = arith.constant 0 : i32
    %c0_i32_0 = arith.constant 0 : i32
    return %arg0, %c0_i32 : i32, i32
  }
}

</mosaic_0001>

<bundles_post_ra>
// kernel: identity.1
= control target key start
LH: loop header
LB: loop body
LE: loop exit
PB: predicated region body
PF: predicated region fallthrough
CT: control target
= control target key end

     0   :  { %s38_s0 = inlined_call_operand.vmem [shape: f32[2,1024], index: 0, kind: input, shape index: {}, may-alias: {0,1}]   ;;  %s39_s1 = inlined_call_operand.vmem [shape: f32[2,1024], index: 1, kind: output, shape index: {}, may-alias: {0,1}]  }
   0x1   :  { %v8_v0 = vld [vmem:[%s38_s0] sm:$0xff]  ;;  %v9_v1 = vld [vmem:[%s38_s0 + $0x8] sm:$0xff] }
   0x2   :  { %10 = vst [vmem:[%s39_s1] sm:$0xff] %v8_v0 }
   0x3   :  { %11 = vst [vmem:[%s39_s1 + $0x8] sm:$0xff] %v9_v1 }

</bundles_post_ra>
